<compile_context>
chip_gen: v7x
topology: tpu7x:2x2x1
jax: 0.10.0
libtpu: 0.0.40
codegen_flags: <defaults>
</compile_context>

<pallas_src>
import functools

import jax
import jax.numpy as jnp
from jax import lax
from jax.experimental import pallas as pl
from jax.experimental.pallas import tpu as pltpu

ACTOR_H = 50        # actor hidden width  -> fused hidden lanes [0, 50)
CRITIC_H = 10       # critic hidden width -> fused hidden lanes [50, 60)
HID_PAD = 128       # padded fused hidden width (lanes 60..127 are exact zeros)
OUT_PAD = 128       # padded output lanes: probs in [0, A), value in col A
BIAS_ROWS = 8       # slab rows 0..2 hold b1,b2,b3 (rows 3..7 zero, tile aligned)

# Tolerances: kernel matmuls run in full f32 on the MXU; the remaining delta vs. a
# HIGHEST-precision XLA reference is EUP tanh/exp approximation error (~1e-6) plus
# whatever pass-decomposition the backend picks, so a few 1e-3 is a safe, still
# meaningful bound for softmax probabilities / tanh-bounded values.
ATOL = 2e-3
RTOL = 2e-2


def _round_up(n, m):
    return ((n + m - 1) // m) * m


def init_params(key, state_dim, action_dim):
    """Deterministic synthetic init (shapes mirror AC_NET.__init__, w:(in,out), b:(1,out))."""
    ks = jax.random.split(key, 12)

    def lin(kw, kb, fan_in, fan_out):
        bound = 1.0 / jnp.sqrt(jnp.float32(fan_in))
        w = jax.random.uniform(kw, (fan_in, fan_out), jnp.float32, -bound, bound)
        b = jax.random.uniform(kb, (1, fan_out), jnp.float32, -bound, bound)
        return w, b

    wa1, ba1 = lin(ks[0], ks[1], state_dim, ACTOR_H)
    wa2, ba2 = lin(ks[2], ks[3], ACTOR_H, ACTOR_H)
    wa3, ba3 = lin(ks[4], ks[5], ACTOR_H, action_dim)
    wv1, bv1 = lin(ks[6], ks[7], state_dim, CRITIC_H)
    wv2, bv2 = lin(ks[8], ks[9], CRITIC_H, CRITIC_H)
    wv3, bv3 = lin(ks[10], ks[11], CRITIC_H, 1)

    return dict(
        wa1=wa1, ba1=ba1, wa2=wa2, ba2=ba2, wa3=wa3, ba3=ba3,
        wv1=wv1, bv1=bv1, wv2=wv2, bv2=bv2, wv3=wv3, bv3=bv3,
    )


def pack_params(params, state_dim, action_dim):
    """Pack all 12 tensors into one (R, 128) f32 slab (one DMA per kernel call).

    Row layout (all weight offsets 8-aligned):
      [0:3)                         b1 | b2 | b3     (fused, lane-padded)
      [8 : 8+SD_pad)                W1 = [wa1 | wv1]
      [8+SD_pad : 8+SD_pad+128)     W2 = blockdiag(wa2, wv2)
      [8+SD_pad+128 : +256)         W3 = actor->cols[0:A), critic->col A
    """
    sd_pad = _round_up(state_dim, 8)
    w1_off = BIAS_ROWS
    w2_off = w1_off + sd_pad
    w3_off = w2_off + HID_PAD
    rows = w3_off + HID_PAD

    a0, a1 = 0, ACTOR_H                    # actor hidden lanes
    c0, c1 = ACTOR_H, ACTOR_H + CRITIC_H   # critic hidden lanes

    slab = jnp.zeros((rows, OUT_PAD), jnp.float32)

    # biases
    slab = slab.at[0, a0:a1].set(params["ba1"][0])
    slab = slab.at[0, c0:c1].set(params["bv1"][0])
    slab = slab.at[1, a0:a1].set(params["ba2"][0])
    slab = slab.at[1, c0:c1].set(params["bv2"][0])
    slab = slab.at[2, 0:action_dim].set(params["ba3"][0])
    slab = slab.at[2, action_dim].set(params["bv3"][0, 0])

    # layer 1: state -> fused hidden
    slab = slab.at[w1_off:w1_off + state_dim, a0:a1].set(params["wa1"])
    slab = slab.at[w1_off:w1_off + state_dim, c0:c1].set(params["wv1"])

    # layer 2: block-diagonal fused hidden -> fused hidden
    slab = slab.at[w2_off + a0:w2_off + a1, a0:a1].set(params["wa2"])
    slab = slab.at[w2_off + c0:w2_off + c1, c0:c1].set(params["wv2"])

    # layer 3: fused hidden -> [logits | value | zeros]
    slab = slab.at[w3_off + a0:w3_off + a1, 0:action_dim].set(params["wa3"])
    slab = slab.at[w3_off + c0:w3_off + c1, action_dim].set(params["wv3"][:, 0])

    return slab


def _ac_net_kernel(x_ref, slab_ref, out_ref, *, sd_pad, action_dim):
    w1_off = BIAS_ROWS
    w2_off = w1_off + sd_pad
    w3_off = w2_off + HID_PAD

    x = x_ref[...]                                    # (TB, sd_pad) f32

    # One aligned load for all three biases; slice the loaded vreg tile.
    bias_tile = slab_ref[0:BIAS_ROWS, :]              # (8, 128)
    b1 = bias_tile[0:1, :]
    b2 = bias_tile[1:2, :]
    b3 = bias_tile[2:3, :]

    w1 = slab_ref[w1_off:w1_off + sd_pad, :]          # (sd_pad, 128)
    w2 = slab_ref[w2_off:w2_off + HID_PAD, :]         # (128, 128)
    w3 = slab_ref[w3_off:w3_off + HID_PAD, :]         # (128, 128)

    # Fused actor+critic MLP (3 matmuls instead of 6). Padding lanes stay exactly 0.
    h = jnp.tanh(jnp.dot(x, w1, preferred_element_type=jnp.float32) + b1)
    h = jnp.tanh(jnp.dot(h, w2, preferred_element_type=jnp.float32) + b2)
    lin = jnp.dot(h, w3, preferred_element_type=jnp.float32) + b3     # (TB, 128)

    # Softmax over the action lanes only (cols < action_dim). PyTorch's
    # Softmax(dim=0) on the module's 1-D input is softmax over actions, which
    # for the batched layout is axis=-1 per row. Col `action_dim` carries the
    # critic value untouched; remaining lanes stay 0.
    col = lax.broadcasted_iota(jnp.int32, lin.shape, 1)
    amask = col < action_dim
    m = jnp.max(jnp.where(amask, lin, -1e30), axis=-1, keepdims=True)
    e = jnp.where(amask, jnp.exp(lin - m), 0.0)
    denom = jnp.sum(e, axis=-1, keepdims=True)
    probs = e / denom                                  # exact divide (probs sum to 1)

    out_ref[...] = probs + jnp.where(col == action_dim, lin, 0.0)


@functools.partial(jax.jit, static_argnames=("state_dim", "action_dim"))
def _ac_net_forward_2d(x2d, slab, *, state_dim, action_dim):
    """x2d: (B, state_dim) f32 -> packed (B, 128) output (probs | value | zeros)."""
    b = x2d.shape[0]
    sd_pad = _round_up(state_dim, 8)

    b_pad = _round_up(b, 8)
    tb = min(b_pad, 128)                 # batch tile (sublane aligned)
    b_pad = _round_up(b_pad, tb)

    xp = jnp.zeros((b_pad, sd_pad), jnp.float32)
    xp = xp.at[:b, :state_dim].set(x2d.astype(jnp.float32))

    rows = slab.shape[0]
    kernel = functools.partial(_ac_net_kernel, sd_pad=sd_pad, action_dim=action_dim)

    out = pl.pallas_call(
        kernel,
        out_shape=jax.ShapeDtypeStruct((b_pad, OUT_PAD), jnp.float32),
        grid=(b_pad // tb,),
        in_specs=[
            pl.BlockSpec((tb, sd_pad), lambda i: (i, 0)),       # batch tile of states
            pl.BlockSpec((rows, OUT_PAD), lambda i: (0, 0)),    # whole weight slab, resident
        ],
        out_specs=pl.BlockSpec((tb, OUT_PAD), lambda i: (i, 0)),
        compiler_params=pltpu.CompilerParams(
            dimension_semantics=("parallel",),                   # v7x: 2 TCs split batch tiles
        ),
    )(xp, slab)
    return out[:b]


def ac_net_forward(x, slab, *, state_dim, action_dim):
    """Mirrors AC_NET.forward.

    x: (state_dim,)    -> (probs (A,),    value (1,))      [PyTorch act() path]
    x: (B, state_dim)  -> (probs (B, A),  value (B, 1))    [batched path]
    """
    if x.ndim == 1:
        out = _ac_net_forward_2d(x.reshape(1, -1), slab,
                                 state_dim=state_dim, action_dim=action_dim)
        return out[0, :action_dim], out[0, action_dim:action_dim + 1]
    out = _ac_net_forward_2d(x, slab, state_dim=state_dim, action_dim=action_dim)
    return out[:, :action_dim], out[:, action_dim:action_dim + 1]


def _reference_forward(x, p):
    """Pure-JAX reference matching the PyTorch forward for a 1-D state x.

    Uses HIGHEST matmul precision so the reference itself is true f32 (XLA:TPU's
    DEFAULT precision does bf16 passes, which is what broke the previous check).
    """
    hp = lax.Precision.HIGHEST
    h = jnp.tanh(jnp.dot(x, p["wa1"], precision=hp) + p["ba1"][0])
    h = jnp.tanh(jnp.dot(h, p["wa2"], precision=hp) + p["ba2"][0])
    logits = jnp.dot(h, p["wa3"], precision=hp) + p["ba3"][0]
    probs = jax.nn.softmax(logits, axis=0)
    v = jnp.tanh(jnp.dot(x, p["wv1"], precision=hp) + p["bv1"][0])
    v = jnp.tanh(jnp.dot(v, p["wv2"], precision=hp) + p["bv2"][0])
    value = jnp.dot(v, p["wv3"], precision=hp) + p["bv3"][0]
    return probs, value


if __name__ == "__main__":
    state_dim = 8
    action_dim = 4   # .act() samples from range(4)

    key = jax.random.PRNGKey(0)
    k_param, k_x, k_xb = jax.random.split(key, 3)
    params = init_params(k_param, state_dim, action_dim)
    slab = pack_params(params, state_dim, action_dim)   # packed once, reused per call

    # ---- single-state path (mirrors AC_NET.act) ----
    x = jax.random.normal(k_x, (state_dim,), dtype=jnp.float32)
    probs, value = ac_net_forward(x, slab, state_dim=state_dim, action_dim=action_dim)
    jax.block_until_ready((probs, value))

    ref_probs, ref_value = _reference_forward(x, params)
    assert probs.shape == (action_dim,) and value.shape == (1,)
    assert jnp.allclose(probs, ref_probs, atol=ATOL, rtol=RTOL)
    assert jnp.allclose(value, ref_value, atol=ATOL, rtol=RTOL)
    assert jnp.allclose(jnp.sum(probs), 1.0, atol=1e-3)

    # ---- batched path (softmax per row over the action axis) ----
    B = 16
    xb = jax.random.normal(k_xb, (B, state_dim), dtype=jnp.float32)
    probs_b, value_b = ac_net_forward(xb, slab, state_dim=state_dim, action_dim=action_dim)
    jax.block_until_ready((probs_b, value_b))

    ref_pb, ref_vb = jax.vmap(lambda xi: _reference_forward(xi, params))(xb)
    assert probs_b.shape == (B, action_dim) and value_b.shape == (B, 1)
    assert jnp.allclose(probs_b, ref_pb, atol=ATOL, rtol=RTOL)
    assert jnp.allclose(value_b, ref_vb, atol=ATOL, rtol=RTOL)
    assert jnp.allclose(jnp.sum(probs_b, axis=-1), jnp.ones((B,)), atol=1e-3)

    print("KERNEL_OK")
</pallas_src>

<mosaic_0001>
module attributes {stable_mosaic.version = 11 : i64} {
  func.func @_ac_net_kernel(%arg0: i32, %arg1: memref<8x8xf32, #tpu.memory_space<vmem>>, %arg2: memref<272x128xf32, #tpu.memory_space<vmem>>, %arg3: memref<8x128xf32, #tpu.memory_space<vmem>>) attributes {dimension_semantics = [#tpu.dimension_semantics<parallel>], iteration_bounds = array<i64: 1>, scalar_prefetch = 0 : i64, scratch_operands = 0 : i64, tpu.core_type = #tpu.core_type<tc>, window_params = [{transform_indices = @transform_0, window_bounds = array<i64: 8, 8>}, {pipeline_mode = #tpu.pipeline_mode<synchronous>, transform_indices = @transform_1, window_bounds = array<i64: 272, 128>}, {transform_indices = @transform_2, window_bounds = array<i64: 8, 128>}]} {
    %c0 = arith.constant 0 : index
    %c0_0 = arith.constant 0 : index
    %0 = vector.load %arg1[%c0, %c0_0] : memref<8x8xf32, #tpu.memory_space<vmem>>, vector<8x8xf32>
    %c0_1 = arith.constant 0 : index
    %c0_2 = arith.constant 0 : index
    %1 = vector.load %arg2[%c0_1, %c0_2] : memref<272x128xf32, #tpu.memory_space<vmem>>, vector<8x128xf32>
    %2 = vector.extract_strided_slice %1 {offsets = [0, 0], sizes = [1, 128], strides = [1, 1]} : vector<8x128xf32> to vector<1x128xf32>
    %3 = vector.extract_strided_slice %1 {offsets = [1, 0], sizes = [1, 128], strides = [1, 1]} : vector<8x128xf32> to vector<1x128xf32>
    %4 = vector.extract_strided_slice %1 {offsets = [2, 0], sizes = [1, 128], strides = [1, 1]} : vector<8x128xf32> to vector<1x128xf32>
    %c8 = arith.constant 8 : index
    %c0_3 = arith.constant 0 : index
    %5 = vector.load %arg2[%c8, %c0_3] : memref<272x128xf32, #tpu.memory_space<vmem>>, vector<8x128xf32>
    %c16 = arith.constant 16 : index
    %c0_4 = arith.constant 0 : index
    %6 = vector.load %arg2[%c16, %c0_4] : memref<272x128xf32, #tpu.memory_space<vmem>>, vector<128x128xf32>
    %c144 = arith.constant 144 : index
    %c0_5 = arith.constant 0 : index
    %7 = vector.load %arg2[%c144, %c0_5] : memref<272x128xf32, #tpu.memory_space<vmem>>, vector<128x128xf32>
    %cst = arith.constant dense<0.000000e+00> : vector<8x128xf32>
    %8 = tpu.matmul %0, %5, %cst {dimension_numbers = #tpu.dot_dimension_numbers<[1], [0], [0], [1], [0, 0, 1, 1], [], []>} : vector<8x8xf32>, vector<8x128xf32>, vector<8x128xf32> -> vector<8x128xf32>
    %9 = vector.broadcast %2 : vector<1x128xf32> to vector<8x128xf32>
    %10 = arith.addf %8, %9 : vector<8x128xf32>
    %11 = math.tanh %10 : vector<8x128xf32>
    %cst_6 = arith.constant dense<0.000000e+00> : vector<8x128xf32>
    %12 = tpu.matmul %11, %6, %cst_6 {dimension_numbers = #tpu.dot_dimension_numbers<[1], [0], [0], [1], [0, 0, 1, 1], [], []>} : vector<8x128xf32>, vector<128x128xf32>, vector<8x128xf32> -> vector<8x128xf32>
    %13 = vector.broadcast %3 : vector<1x128xf32> to vector<8x128xf32>
    %14 = arith.addf %12, %13 : vector<8x128xf32>
    %15 = math.tanh %14 : vector<8x128xf32>
    %cst_7 = arith.constant dense<0.000000e+00> : vector<8x128xf32>
    %16 = tpu.matmul %15, %7, %cst_7 {dimension_numbers = #tpu.dot_dimension_numbers<[1], [0], [0], [1], [0, 0, 1, 1], [], []>} : vector<8x128xf32>, vector<128x128xf32>, vector<8x128xf32> -> vector<8x128xf32>
    %17 = vector.broadcast %4 : vector<1x128xf32> to vector<8x128xf32>
    %18 = arith.addf %16, %17 : vector<8x128xf32>
    %19 = tpu.iota {dimensions = array<i32: 1>} : vector<8x128xi32>
    %c4_i32 = arith.constant 4 : i32
    %20 = vector.broadcast %c4_i32 : i32 to vector<8x128xi32>
    %21 = arith.cmpi slt, %19, %20 : vector<8x128xi32>
    %cst_8 = arith.constant -1.000000e+30 : f32
    %22 = vector.broadcast %cst_8 : f32 to vector<8x128xf32>
    %23 = arith.select %21, %18, %22 : vector<8x128xi1>, vector<8x128xf32>
    %cst_9 = arith.constant dense<0xFF800000> : vector<8xf32>
    %24 = vector.multi_reduction <maximumf>, %23, %cst_9 [1] : vector<8x128xf32> to vector<8xf32>
    %25 = vector.shape_cast %24 : vector<8xf32> to vector<8x1xf32>
    %26 = vector.broadcast %25 : vector<8x1xf32> to vector<8x128xf32>
    %27 = arith.subf %18, %26 : vector<8x128xf32>
    %28 = math.exp %27 : vector<8x128xf32>
    %cst_10 = arith.constant 0.000000e+00 : f32
    %29 = vector.broadcast %cst_10 : f32 to vector<8x128xf32>
    %30 = arith.select %21, %28, %29 : vector<8x128xi1>, vector<8x128xf32>
    %cst_11 = arith.constant dense<0.000000e+00> : vector<8xf32>
    %31 = vector.multi_reduction <add>, %30, %cst_11 [1] : vector<8x128xf32> to vector<8xf32>
    %32 = vector.shape_cast %31 : vector<8xf32> to vector<8x1xf32>
    %33 = vector.broadcast %32 : vector<8x1xf32> to vector<8x128xf32>
    %34 = arith.divf %30, %33 : vector<8x128xf32>
    %c4_i32_12 = arith.constant 4 : i32
    %35 = vector.broadcast %c4_i32_12 : i32 to vector<8x128xi32>
    %36 = arith.cmpi eq, %19, %35 : vector<8x128xi32>
    %cst_13 = arith.constant 0.000000e+00 : f32
    %37 = vector.broadcast %cst_13 : f32 to vector<8x128xf32>
    %38 = arith.select %36, %18, %37 : vector<8x128xi1>, vector<8x128xf32>
    %39 = arith.addf %34, %38 : vector<8x128xf32>
    %c0_14 = arith.constant 0 : index
    %c0_15 = arith.constant 0 : index
    %40 = vector.load %arg3[%c0_14, %c0_15] : memref<8x128xf32, #tpu.memory_space<vmem>>, vector<8x128xf32>
    tpu.vector_store %arg3[%c0_14, %c0_15], %39 {strides = array<i32>} : memref<8x128xf32, #tpu.memory_space<vmem>>, vector<8x128xf32>,
    return
  }
  func.func @transform_0(%arg0: i32) -> (i32, i32) {
    %c0_i32 = arith.constant 0 : i32
    %c0_i32_0 = arith.constant 0 : i32
    return %arg0, %c0_i32 : i32, i32
  }
  func.func @transform_1(%arg0: i32) -> (i32, i32) {
    %c0_i32 = arith.constant 0 : i32
    %c0_i32_0 = arith.constant 0 : i32
    %c0_i32_1 = arith.constant 0 : i32
    return %c0_i32, %c0_i32_0 : i32, i32
  }
  func.func @transform_2(%arg0: i32) -> (i32, i32) {
    %c0_i32 = arith.constant 0 : i32
    %c0_i32_0 = arith.constant 0 : i32
    return %arg0, %c0_i32 : i32, i32
  }
}

</mosaic_0001>

<bundles_post_ra>
// kernel: _ac_net_forward_2d.1
= control target key start
LH: loop header
LB: loop body
LE: loop exit
PB: predicated region body
PF: predicated region fallthrough
CT: control target
= control target key end

     0   :  { %7 = vsyncpa [#allocation3], 0  ;;  %s509_s9 = smov [#allocation2]   ;;  %s567_s0 = inlined_call_operand.vmem [shape: f32[8,8], index: 0, kind: input, shape index: {}]   ;;  %s568_s1 = inlined_call_operand.hbm [shape: f32[272,128], index: 1, kind: input, shape index: {}]   ;;  %s569_s2 = inlined_call_operand.vmem [shape: f32[8,128], index: 2, kind: output, shape index: {}]  }
   0x1   :  { %s15_s10 = sshll.u32 %s509_s9, 4  ;;  %s485_s13 = scalar_lea.hbm %s568_s1, 4352  ;;  %s16_s10 = int_to_ptr.vmem [resolvable:$true] %s15_s10 }
   0x2   :  { %p486_p0 = scmp.ne.s32.totalorder %s568_s1, %s485_s13  ;;  %p489_p1 = scmp.lt.u32.totalorder %s485_s13, %s568_s1 }
   0x4   :  { %p491_p2 = pnand %p489_p1, %p486_p0 }
   0x6   :  { %494 = shalt.err (!%p491_p2)
}
   0x7   :  { %s495_s18 = scalar_lea.vmem %s16_s10, 4352  ;;  %p500_p4 = scmp.lt.s32.totalorder %s16_s10, %s16_s10 }
   0x8   :  { %p496_p3 = scmp.ne.s32.totalorder %s16_s10, %s495_s18  ;;  %p501_p5 = scmp.lt.s32.totalorder %s495_s18, %s495_s18 }
   0xa   :  { %p502_p6 = por %p501_p5, %p500_p4 }
   0xc   :  { %p503_p7 = pnand %p502_p6, %p496_p3 }
   0xe   :  { %506 = shalt.err (!%p503_p7)
}
   0xf   :  { %s510_s19 = smov 128   ;;  %s511_s20 = smov 8  }
  0x10   :  { %21 = dma.hbm_to_vmem [thread:$0]  %s568_s1, 4352, %s16_s10, [#allocation3], %s510_s19, %s510_s19, %s511_s20  }
  0x11   :  { %507 = dma.done.wait [#allocation3], 4352  }
  0x12   :  { %508 = vsyncadd [#allocation3], 4294962944  ;;  %v512_v0 = vmov 0.0   ;;  %vm513_vm0 = vmmov 0   ;;  %v514_v1 = vmov 0.0|0.0   ;;  %vm64_vm1 = vcmask 64512  }
  0x13   :  { %348 = vmatprep.subr.mxu0 %v512_v0  ;;  %350 = vmatprep.mubr.msk.f32.mxu0 %vm513_vm0, %v512_v0  ;;  %v27_v2 = vld [vmem:[#allocation2 + $0x8] sm:$0xff]  ;;  %v25_v3 = vld [vmem:[%s567_s0] sm:$0xff]  ;;  %v28_v4 = vld [vmem:[#allocation2 + $0x10] sm:$0xff]  ;;  %v60_v43 = vlaneseq }
  0x14   :  { %423 = vmatprep.subr.bf16.mxu1 %v514_v1  ;;  %385 = vmatprep.mubr.msk.f32.mxu1 %vm513_vm0, %v512_v0  ;;  %v29_v5 = vld [vmem:[#allocation2 + $0x18] sm:$0xff]  ;;  %v30_v6 = vld [vmem:[#allocation2 + $0x20] sm:$0xff]  ;;  %v31_v7 = vld [vmem:[#allocation2 + $0x28] sm:$0xff] }
  0x15   :  { %349 = vmatpush3.msra.mxu0 %v27_v2  ;;  %v424_v8 = vpack.c.bf16 %v29_v5, %v28_v4  ;;  %v427_v9 = vpack.c.bf16 %v31_v7, %v30_v6  ;;  %v32_v10 = vld [vmem:[#allocation2 + $0x30] sm:$0xff]  ;;  %v33_v11 = vld [vmem:[#allocation2 + $0x38] sm:$0xff]  ;;  %v34_v13 = vld [vmem:[#allocation2 + $0x40] sm:$0xff]  ;;  %v61_v44 = vshrl.u32 %v60_v43, 7  ;;  %v289_v5 = vand.u32 127, %v60_v43 }
  0x16   :  { %351 = vmatmul.mubr.msk.f32.vlgmr.msra.gmra.mrb[0].mxu0 %vm64_vm1, %v25_v3  ;;  %447 = vmatprep.subr.bf16.mxu0 %v514_v1  ;;  %v430_v12 = vpack.c.bf16 %v33_v11, %v32_v10  ;;  %v35_v14 = vld [vmem:[#allocation2 + $0x48] sm:$0xff]  ;;  %v36_v16 = vld [vmem:[#allocation2 + $0x50] sm:$0xff]  ;;  %v37_v17 = vld [vmem:[#allocation2 + $0x58] sm:$0xff] }
  0x17   :  { %420 = vmatprep.mubr.msk.f32.mxu0 %vm513_vm0, %v512_v0  ;;  %425 = vmatpush3.bf16.msra.mxu1 %v424_v8  ;;  %v433_v15 = vpack.c.bf16 %v35_v14, %v34_v13  ;;  %v436_v18 = vpack.c.bf16 %v37_v17, %v36_v16  ;;  %v38_v19 = vld [vmem:[#allocation2 + $0x60] sm:$0xff]  ;;  %v39_v20 = vld [vmem:[#allocation2 + $0x68] sm:$0xff]  ;;  %v40_v22 = vld [vmem:[#allocation2 + $0x70] sm:$0xff]  ;;  %v62_v45 = vsub.s32 0, %v61_v44  ;;  %v141_v61 = vsub.s32 1, %v61_v44 }
  0x18   :  { %426 = vmatprep.subr.bf16.mxu1 %v514_v1  ;;  %v439_v21 = vpack.c.bf16 %v39_v20, %v38_v19  ;;  %v41_v23 = vld [vmem:[#allocation2 + $0x78] sm:$0xff]  ;;  %v42_v25 = vld [vmem:[#allocation2 + $0x80] sm:$0xff]  ;;  %v43_v26 = vld [vmem:[#allocation2 + $0x88] sm:$0xff]  ;;  %v216_v4 = vsub.s32 2, %v61_v44  ;;  %vm290_vm2 = vcmp.lt.s32.totalorder %v289_v5, 4  ;;  %vm302_vm3 = vcmp.eq.s32.totalorder %v289_v5, 4 }
  0x19   :  { %v442_v24 = vpack.c.bf16 %v41_v23, %v40_v22  ;;  %v445_v27 = vpack.c.bf16 %v43_v26, %v42_v25  ;;  %v44_v28 = vld [vmem:[#allocation2 + $0x90] sm:$0xff]  ;;  %v45_v29 = vld [vmem:[#allocation2 + $0x98] sm:$0xff]  ;;  %v46_v30 = vld [vmem:[#allocation2 + $0xa0] sm:$0xff] }
  0x1a   :  { %v448_v31 = vpack.c.bf16 %v45_v29, %v44_v28  ;;  %v47_v32 = vld [vmem:[#allocation2 + $0xa8] sm:$0xff]  ;;  %v48_v34 = vld [vmem:[#allocation2 + $0xb0] sm:$0xff]  ;;  %v49_v35 = vld [vmem:[#allocation2 + $0xb8] sm:$0xff] }
  0x1b   :  { %428 = vmatpush3.bf16.msra.mxu1 %v427_v9  ;;  %v451_v33 = vpack.c.bf16 %v47_v32, %v46_v30  ;;  %v454_v36 = vpack.c.bf16 %v49_v35, %v48_v34  ;;  %v50_v37 = vld [vmem:[#allocation2 + $0xc0] sm:$0xff]  ;;  %v51_v38 = vld [vmem:[#allocation2 + $0xc8] sm:$0xff]  ;;  %v52_v40 = vld [vmem:[#allocation2 + $0xd0] sm:$0xff] }
  0x1c   :  { %429 = vmatprep.subr.bf16.mxu1 %v514_v1  ;;  %449 = vmatpush3.bf16.msra.mxu0 %v448_v31  ;;  %v457_v39 = vpack.c.bf16 %v51_v38, %v50_v37  ;;  %v53_v41 = vld [vmem:[#allocation2 + $0xd8] sm:$0xff]  ;;  %v26_v46 = vld [vmem:[#allocation2] sm:$0xff]  ;;  %v55_v53 = vld [vmem:[#allocation2 + $0xe8] sm:$0xff] }
  0x1d   :  { %450 = vmatprep.subr.bf16.mxu0 %v514_v1  ;;  %v460_v42 = vpack.c.bf16 %v53_v41, %v52_v40  ;;  %v63_v47 = vrot.slane %v26_v46, %v62_v45  ;;  %v54_v52 = vld [vmem:[#allocation2 + $0xe0] sm:$0xff]  ;;  %v56_v55 = vld [vmem:[#allocation2 + $0xf0] sm:$0xff]  ;;  %v57_v56 = vld [vmem:[#allocation2 + $0xf8] sm:$0xff]  ;;  %v142_v62 = vrot.slane %v26_v46, %v141_v61  ;;  %v217_v6 = vrot.slane %v26_v46, %v216_v4 }
  0x1e   :  { %v463_v54 = vpack.c.bf16 %v55_v53, %v54_v52  ;;  %v466_v57 = vpack.c.bf16 %v57_v56, %v56_v55  ;;  %v58_v58 = vld [vmem:[#allocation2 + $0x100] sm:$0xff]  ;;  %v59_v59 = vld [vmem:[#allocation2 + $0x108] sm:$0xff] }
  0x1f   :  { %431 = vmatpush3.bf16.msra.mxu1 %v430_v12  ;;  %v469_v60 = vpack.c.bf16 %v59_v59, %v58_v58 }
  0x20   :  { %432 = vmatprep.subr.bf16.mxu1 %v514_v1  ;;  %452 = vmatpush3.bf16.msra.mxu0 %v451_v33 }
  0x21   :  { %453 = vmatprep.subr.bf16.mxu0 %v514_v1 }
  0x23   :  { %434 = vmatpush3.bf16.msra.mxu1 %v433_v15 }
  0x24   :  { %435 = vmatprep.subr.bf16.mxu1 %v514_v1  ;;  %455 = vmatpush3.bf16.msra.mxu0 %v454_v36 }
  0x25   :  { %456 = vmatprep.subr.bf16.mxu0 %v514_v1 }
  0x27   :  { %437 = vmatpush3.bf16.msra.mxu1 %v436_v18 }
  0x28   :  { %438 = vmatprep.subr.bf16.mxu1 %v514_v1  ;;  %458 = vmatpush3.bf16.msra.mxu0 %v457_v39 }
  0x29   :  { %459 = vmatprep.subr.bf16.mxu0 %v514_v1 }
  0x2b   :  { %440 = vmatpush3.bf16.msra.mxu1 %v439_v21 }
  0x2c   :  { %441 = vmatprep.subr.bf16.mxu1 %v514_v1  ;;  %461 = vmatpush3.bf16.msra.mxu0 %v460_v42 }
  0x2d   :  { %462 = vmatprep.subr.bf16.mxu0 %v514_v1 }
  0x2f   :  { %443 = vmatpush3.bf16.msra.mxu1 %v442_v24 }
  0x30   :  { %444 = vmatprep.subr.bf16.mxu1 %v514_v1  ;;  %464 = vmatpush3.bf16.msra.mxu0 %v463_v54 }
  0x31   :  { %465 = vmatprep.subr.bf16.mxu0 %v514_v1 }
  0x33   :  { %446 = vmatpush3.bf16.msra.mxu1 %v445_v27 }
  0x34   :  { %467 = vmatpush3.bf16.msra.mxu0 %v466_v57 }
  0x35   :  { %468 = vmatprep.subr.bf16.mxu0 %v514_v1 }
  0x38   :  { %470 = vmatpush3.bf16.msra.mxu0 %v469_v60 }
  0xe9   :  { %v134_v48 = vpop.f32.mrb[0].mxu0 }
  0xea   :  { %v135_v49 = vadd.f32 %v134_v48, %v63_v47  ;;  %v352_v50 = vpop.f32.mrb[1].mxu0 }
  0xec   :  { %477 = vtanh.f32 %v135_v49 }
  0xf6   :  { %v478_v51 = vpop.eup %477 }
  0xf7   :  { %386 = vmatmul.mubr.f32.vlgmr.msra.gmra.mrb[0].mxu1 %v478_v51 }
 0x1ca   :  { %v209_v63 = vpop.f32.mrb[0].mxu1 }
 0x1cb   :  { %v210_v0 = vadd.f32 %v209_v63, %v142_v62  ;;  %v387_v2 = vpop.f32.mrb[1].mxu1 }
 0x1cd   :  { %479 = vtanh.f32 %v210_v0 }
 0x1d7   :  { %v480_v3 = vpop.eup %479 }
 0x1d8   :  { %421 = vmatmul.mubr.f32.vlgmr.msra.gmra.mrb[2].mxu0 %v480_v3 }
 0x2ab   :  { %v284_v7 = vpop.f32.mrb[2].mxu0 }
 0x2ac   :  { %v285_v8 = vadd.f32 %v284_v7, %v217_v6  ;;  %v422_v9 = vpop.f32.mrb[3].mxu0 }
 0x2ae   :  { %v291_v10 = vsel %vm290_vm2, %v285_v8, -1e+30  ;;  %v303_v18 = vsel %vm302_vm3, %v285_v8, 0.0 }
 0x2af   :  { %292 = vmax.xlane.f32.xlu0 %v291_v10 }
 0x33c   :  { %v293_v11 = vpop.xlane.xlu0 %292 }
 0x33d   :  { %v294_v1 = vsub.f32 %v285_v8, %v293_v11 }
 0x33f   :  { %v295_v12 = vmul.f32 1.442695, %v294_v1 }
 0x341   :  { %481 = vpow2.f32 %v295_v12 }
 0x34b   :  { %v482_v13 = vpop.eup %481 }
 0x34c   :  { %v297_v14 = vsel %vm290_vm2, %v482_v13, 0.0 }
 0x34d   :  { %298 = vadd.xlane.f32.xlu0 %v297_v14 }
 0x3da   :  { %v299_v15 = vpop.xlane.xlu0 %298 }
 0x3db   :  { %483 = vrcp.f32 %v299_v15 }
 0x3e5   :  { %v484_v16 = vpop.eup %483 }
 0x3e6   :  { %v301_v17 = vmul.f32 %v484_v16, %v297_v14 }
 0x3e8   :  { %v304_v19 = vadd.f32 %v303_v18, %v301_v17 }
 0x3ea   :  { %305 = vst [vmem:[%s569_s2] sm:$0xff] %v304_v19 }
 0x3eb   :  { %310 = vsyncpa [#allocation3], 1 }

</bundles_post_ra>
